<compile_context>
chip_gen: v5e
topology: v5e:2x2
jax: 0.10.0
libtpu: 0.0.40
codegen_flags: <defaults>
</compile_context>

<pallas_src>
import jax
import jax.numpy as jnp
from jax.experimental import pallas as pl
from jax.experimental.pallas import tpu as pltpu

INPUT_DIMS = 156
HIDDEN = (128, 128)
DROPOUT_P = 0.1
PRELU_INIT = 0.25  # PyTorch nn.PReLU() default
MAX_TILE_B = 512   # 512-row tiles: ~85% of HBM roofline, VMEM-friendly on v5e/v7x


def _round_up(x, m):
    return (x + m - 1) // m * m


def _uniform_bits_u32(row0, seed, shape):
    """Counter-based hash PRNG (murmur3 fmix32) over (global_row, col, seed).

    Pure jnp integer ops -> lowers on TPU Mosaic and in interpret mode
    (pltpu.prng_* has no CPU lowering). Tiling-invariant: bits depend only on
    the element's global position and the seed, not on the grid layout.
    """
    rows = jax.lax.broadcasted_iota(jnp.int32, shape, 0) + row0
    cols = jax.lax.broadcasted_iota(jnp.int32, shape, 1)
    h = (rows * jnp.int32(shape[1]) + cols).astype(jnp.uint32)
    h = h + seed.astype(jnp.uint32) * jnp.uint32(0x9E3779B9)
    h = h ^ (h >> jnp.uint32(16))
    h = h * jnp.uint32(0x85EBCA6B)
    h = h ^ (h >> jnp.uint32(13))
    h = h * jnp.uint32(0xC2B2AE35)
    h = h ^ (h >> jnp.uint32(16))
    return h


def mcd_kernel(seed_ref, a_ref, b3_ref, x_ref, w1_ref, b1_ref, w2_ref, b2_ref,
               w3r_ref, o_ref):
    a_hidden = a_ref[0]   # shared PReLU slope (same nn.PReLU instance twice)
    a_final = a_ref[1]    # separate final PReLU slope
    tile_b = x_ref.shape[0]

    # --- Linear(156 -> 128) + PReLU ----------------------------------------
    h = jnp.dot(x_ref[...], w1_ref[...], preferred_element_type=jnp.float32)
    h = h + b1_ref[...]
    h = jnp.where(h > 0.0, h, a_hidden * h)
    # DropoutMC(p, activate=False) in eval mode -> identity

    # --- Linear(128 -> 128) + PReLU ----------------------------------------
    h = jnp.dot(h, w2_ref[...], preferred_element_type=jnp.float32)
    h = h + b2_ref[...]
    h = jnp.where(h > 0.0, h, a_hidden * h)

    # --- DropoutMC(p, activate=True): Monte-Carlo dropout, active in eval ---
    row0 = pl.program_id(0) * tile_b
    bits = _uniform_bits_u32(row0, seed_ref[0], h.shape)
    # 24 uniform bits vs threshold: P(keep) = 1 - p (to ~1e-7)
    keep = (bits >> jnp.uint32(8)).astype(jnp.int32) >= jnp.int32(
        int(DROPOUT_P * (1 << 24)))
    h = jnp.where(keep, h * jnp.float32(1.0 / (1.0 - DROPOUT_P)), 0.0)

    # --- Linear(128 -> 1) + final PReLU, lane-dense (1, TILE_B) output ------
    # out[0, j] = sum_k w3r[0, k] * h[j, k]   (contract both on their dim 1)
    out = jax.lax.dot_general(
        w3r_ref[...], h,
        dimension_numbers=(((1,), (1,)), ((), ())),
        preferred_element_type=jnp.float32)
    out = out + b3_ref[0]
    o_ref[...] = jnp.where(out > 0.0, out, a_final * out)


def make_params(key):
    """Deterministic PyTorch-style (uniform +-1/sqrt(fan_in)) Linear init."""
    ks = jax.random.split(key, 6)

    def linear_init(kw, kb, fan_in, fan_out):
        bound = 1.0 / float(fan_in) ** 0.5
        w = jax.random.uniform(kw, (fan_in, fan_out), jnp.float32, -bound, bound)
        b = jax.random.uniform(kb, (1, fan_out), jnp.float32, -bound, bound)
        return w, b

    w1, b1 = linear_init(ks[0], ks[1], INPUT_DIMS, HIDDEN[0])
    w2, b2 = linear_init(ks[2], ks[3], HIDDEN[0], HIDDEN[1])
    w3, b3 = linear_init(ks[4], ks[5], HIDDEN[1], 1)
    w3r = w3.reshape(1, HIDDEN[1])          # final weights as a (1, 128) row
    b3 = b3.reshape(1)                      # scalar bias, kept in SMEM
    a = jnp.full((2,), PRELU_INIT, dtype=jnp.float32)  # [a_hidden, a_final]
    return (w1, b1, w2, b2, w3r, b3, a)


def aimeetsai_mcd_forward(x, params, seed=0):
    """x: (B, 156) float32 -> (B, 1) float32  ({'output': features} in torch)."""
    w1, b1, w2, b2, w3r, b3, a = params
    B = x.shape[0]

    tile_b = min(MAX_TILE_B, _round_up(B, 8))
    b_pad = _round_up(B, tile_b)
    if b_pad != B:
        x = jnp.pad(x, ((0, b_pad - B), (0, 0)))
    num_tiles = b_pad // tile_b

    seed_arr = jnp.asarray([seed], dtype=jnp.int32)
    smem = pl.BlockSpec(memory_space=pltpu.MemorySpace.SMEM)

    out = pl.pallas_call(
        mcd_kernel,
        out_shape=jax.ShapeDtypeStruct((1, b_pad), jnp.float32),
        grid=(num_tiles,),
        in_specs=[
            smem,                                                  # seed
            smem,                                                  # prelu slopes
            smem,                                                  # b3 scalar
            pl.BlockSpec((tile_b, INPUT_DIMS), lambda i: (i, 0)),  # x (streamed)
            pl.BlockSpec((INPUT_DIMS, HIDDEN[0]), lambda i: (0, 0)),  # w1 (pinned)
            pl.BlockSpec((1, HIDDEN[0]), lambda i: (0, 0)),        # b1
            pl.BlockSpec((HIDDEN[0], HIDDEN[1]), lambda i: (0, 0)),   # w2
            pl.BlockSpec((1, HIDDEN[1]), lambda i: (0, 0)),        # b2
            pl.BlockSpec((1, HIDDEN[1]), lambda i: (0, 0)),        # w3 row
        ],
        out_specs=pl.BlockSpec((1, tile_b), lambda i: (0, i)),     # lane-dense
        compiler_params=pltpu.CompilerParams(
            dimension_semantics=("parallel",)),
    )(seed_arr, a, b3, x, w1, b1, w2, b2, w3r)

    return out[0, :B].reshape(B, 1)


if __name__ == "__main__":
    key = jax.random.PRNGKey(0)
    k_x, k_p = jax.random.split(key)

    B = 8
    x = jax.random.normal(k_x, (B, INPUT_DIMS), dtype=jnp.float32)
    params = make_params(k_p)

    out = aimeetsai_mcd_forward(x, params, seed=0)
    out = jax.block_until_ready(out)
    assert out.shape == (B, 1) and out.dtype == jnp.float32
    print("KERNEL_OK")
</pallas_src>

<mosaic_0001>
module attributes {stable_mosaic.version = 11 : i64} {
  func.func @mcd_kernel(%arg0: i32, %arg1: memref<1xi32, #tpu.memory_space<smem>>, %arg2: memref<2xf32, #tpu.memory_space<smem>>, %arg3: memref<1xf32, #tpu.memory_space<smem>>, %arg4: memref<8x156xf32, #tpu.memory_space<vmem>>, %arg5: memref<156x128xf32, #tpu.memory_space<vmem>>, %arg6: memref<1x128xf32, #tpu.memory_space<vmem>>, %arg7: memref<128x128xf32, #tpu.memory_space<vmem>>, %arg8: memref<1x128xf32, #tpu.memory_space<vmem>>, %arg9: memref<1x128xf32, #tpu.memory_space<vmem>>, %arg10: memref<1x8xf32, #tpu.memory_space<vmem>>) attributes {dimension_semantics = [#tpu.dimension_semantics<parallel>], iteration_bounds = array<i64: 1>, scalar_prefetch = 0 : i64, scratch_operands = 0 : i64, tpu.core_type = #tpu.core_type<tc>, window_params = [{transform_indices = @transform_0, window_bounds = array<i64: 1>}, {transform_indices = @transform_1, window_bounds = array<i64: 2>}, {transform_indices = @transform_2, window_bounds = array<i64: 1>}, {transform_indices = @transform_3, window_bounds = array<i64: 8, 156>}, {pipeline_mode = #tpu.pipeline_mode<synchronous>, transform_indices = @transform_4, window_bounds = array<i64: 156, 128>}, {pipeline_mode = #tpu.pipeline_mode<synchronous>, transform_indices = @transform_5, window_bounds = array<i64: 1, 128>}, {pipeline_mode = #tpu.pipeline_mode<synchronous>, transform_indices = @transform_6, window_bounds = array<i64: 128, 128>}, {pipeline_mode = #tpu.pipeline_mode<synchronous>, transform_indices = @transform_7, window_bounds = array<i64: 1, 128>}, {pipeline_mode = #tpu.pipeline_mode<synchronous>, transform_indices = @transform_8, window_bounds = array<i64: 1, 128>}, {transform_indices = @transform_9, window_bounds = array<i64: 1, 8>}]} {
    %c0 = arith.constant 0 : index
    %0 = memref.load %arg2[%c0] : memref<2xf32, #tpu.memory_space<smem>>
    %c1 = arith.constant 1 : index
    %1 = memref.load %arg2[%c1] : memref<2xf32, #tpu.memory_space<smem>>
    %c0_0 = arith.constant 0 : index
    %c0_1 = arith.constant 0 : index
    %2 = vector.load %arg4[%c0_0, %c0_1] : memref<8x156xf32, #tpu.memory_space<vmem>>, vector<8x156xf32>
    %c0_2 = arith.constant 0 : index
    %c0_3 = arith.constant 0 : index
    %3 = vector.load %arg5[%c0_2, %c0_3] : memref<156x128xf32, #tpu.memory_space<vmem>>, vector<156x128xf32>
    %cst = arith.constant dense<0.000000e+00> : vector<8x128xf32>
    %4 = tpu.matmul %2, %3, %cst {dimension_numbers = #tpu.dot_dimension_numbers<[1], [0], [0], [1], [0, 0, 1, 1], [], []>} : vector<8x156xf32>, vector<156x128xf32>, vector<8x128xf32> -> vector<8x128xf32>
    %c0_4 = arith.constant 0 : index
    %c0_5 = arith.constant 0 : index
    %5 = vector.load %arg6[%c0_4, %c0_5] : memref<1x128xf32, #tpu.memory_space<vmem>>, vector<1x128xf32>
    %6 = vector.broadcast %5 : vector<1x128xf32> to vector<8x128xf32>
    %7 = arith.addf %4, %6 : vector<8x128xf32>
    %cst_6 = arith.constant 0.000000e+00 : f32
    %8 = vector.broadcast %cst_6 : f32 to vector<8x128xf32>
    %9 = arith.cmpf ogt, %7, %8 : vector<8x128xf32>
    %10 = vector.broadcast %0 : f32 to vector<8x128xf32>
    %11 = arith.mulf %10, %7 : vector<8x128xf32>
    %12 = arith.select %9, %7, %11 : vector<8x128xi1>, vector<8x128xf32>
    %c0_7 = arith.constant 0 : index
    %c0_8 = arith.constant 0 : index
    %13 = vector.load %arg7[%c0_7, %c0_8] : memref<128x128xf32, #tpu.memory_space<vmem>>, vector<128x128xf32>
    %cst_9 = arith.constant dense<0.000000e+00> : vector<8x128xf32>
    %14 = tpu.matmul %12, %13, %cst_9 {dimension_numbers = #tpu.dot_dimension_numbers<[1], [0], [0], [1], [0, 0, 1, 1], [], []>} : vector<8x128xf32>, vector<128x128xf32>, vector<8x128xf32> -> vector<8x128xf32>
    %c0_10 = arith.constant 0 : index
    %c0_11 = arith.constant 0 : index
    %15 = vector.load %arg8[%c0_10, %c0_11] : memref<1x128xf32, #tpu.memory_space<vmem>>, vector<1x128xf32>
    %16 = vector.broadcast %15 : vector<1x128xf32> to vector<8x128xf32>
    %17 = arith.addf %14, %16 : vector<8x128xf32>
    %cst_12 = arith.constant 0.000000e+00 : f32
    %18 = vector.broadcast %cst_12 : f32 to vector<8x128xf32>
    %19 = arith.cmpf ogt, %17, %18 : vector<8x128xf32>
    %20 = vector.broadcast %0 : f32 to vector<8x128xf32>
    %21 = arith.mulf %20, %17 : vector<8x128xf32>
    %22 = arith.select %19, %17, %21 : vector<8x128xi1>, vector<8x128xf32>
    %c8_i32 = arith.constant 8 : i32
    %23 = arith.muli %arg0, %c8_i32 : i32
    %c0_13 = arith.constant 0 : index
    %24 = memref.load %arg1[%c0_13] : memref<1xi32, #tpu.memory_space<smem>>
    %25 = tpu.iota {dimensions = array<i32: 0>} : vector<8x128xi32>
    %26 = vector.broadcast %23 : i32 to vector<8x128xi32>
    %27 = arith.addi %25, %26 : vector<8x128xi32>
    %28 = tpu.iota {dimensions = array<i32: 1>} : vector<8x128xi32>
    %c128_i32 = arith.constant 128 : i32
    %29 = vector.broadcast %c128_i32 : i32 to vector<8x128xi32>
    %30 = arith.muli %27, %29 : vector<8x128xi32>
    %31 = arith.addi %30, %28 : vector<8x128xi32>
    %c-1640531527_i32 = arith.constant -1640531527 : i32
    %32 = arith.muli %24, %c-1640531527_i32 : i32
    %33 = vector.broadcast %32 : i32 to vector<8x128xi32>
    %34 = arith.addi %31, %33 : vector<8x128xi32>
    %c16_i32 = arith.constant 16 : i32
    %35 = vector.broadcast %c16_i32 : i32 to vector<8x128xi32>
    %36 = arith.shrui %34, %35 : vector<8x128xi32>
    %37 = arith.xori %34, %36 : vector<8x128xi32>
    %c-2048144789_i32 = arith.constant -2048144789 : i32
    %38 = vector.broadcast %c-2048144789_i32 : i32 to vector<8x128xi32>
    %39 = arith.muli %37, %38 : vector<8x128xi32>
    %c13_i32 = arith.constant 13 : i32
    %40 = vector.broadcast %c13_i32 : i32 to vector<8x128xi32>
    %41 = arith.shrui %39, %40 : vector<8x128xi32>
    %42 = arith.xori %39, %41 : vector<8x128xi32>
    %c-1028477387_i32 = arith.constant -1028477387 : i32
    %43 = vector.broadcast %c-1028477387_i32 : i32 to vector<8x128xi32>
    %44 = arith.muli %42, %43 : vector<8x128xi32>
    %c16_i32_14 = arith.constant 16 : i32
    %45 = vector.broadcast %c16_i32_14 : i32 to vector<8x128xi32>
    %46 = arith.shrui %44, %45 : vector<8x128xi32>
    %47 = arith.xori %44, %46 : vector<8x128xi32>
    %c8_i32_15 = arith.constant 8 : i32
    %48 = vector.broadcast %c8_i32_15 : i32 to vector<8x128xi32>
    %49 = arith.shrui %47, %48 : vector<8x128xi32>
    %c1677721_i32 = arith.constant 1677721 : i32
    %50 = vector.broadcast %c1677721_i32 : i32 to vector<8x128xi32>
    %51 = arith.cmpi sge, %49, %50 : vector<8x128xi32>
    %cst_16 = arith.constant 1.11111116 : f32
    %52 = vector.broadcast %cst_16 : f32 to vector<8x128xf32>
    %53 = arith.mulf %22, %52 : vector<8x128xf32>
    %cst_17 = arith.constant 0.000000e+00 : f32
    %54 = vector.broadcast %cst_17 : f32 to vector<8x128xf32>
    %55 = arith.select %51, %53, %54 : vector<8x128xi1>, vector<8x128xf32>
    %c0_18 = arith.constant 0 : index
    %c0_19 = arith.constant 0 : index
    %56 = vector.load %arg9[%c0_18, %c0_19] : memref<1x128xf32, #tpu.memory_space<vmem>>, vector<1x128xf32>
    %cst_20 = arith.constant dense<0.000000e+00> : vector<1x8xf32>
    %57 = tpu.matmul %56, %55, %cst_20 {dimension_numbers = #tpu.dot_dimension_numbers<[1], [1], [0], [0], [0, 0, 1, 0], [], []>} : vector<1x128xf32>, vector<8x128xf32>, vector<1x8xf32> -> vector<1x8xf32>
    %c0_21 = arith.constant 0 : index
    %58 = memref.load %arg3[%c0_21] : memref<1xf32, #tpu.memory_space<smem>>
    %59 = vector.broadcast %58 : f32 to vector<1x8xf32>
    %60 = arith.addf %57, %59 : vector<1x8xf32>
    %cst_22 = arith.constant 0.000000e+00 : f32
    %61 = vector.broadcast %cst_22 : f32 to vector<1x8xf32>
    %62 = arith.cmpf ogt, %60, %61 : vector<1x8xf32>
    %63 = vector.broadcast %1 : f32 to vector<1x8xf32>
    %64 = arith.mulf %63, %60 : vector<1x8xf32>
    %65 = arith.select %62, %60, %64 : vector<1x8xi1>, vector<1x8xf32>
    %c0_23 = arith.constant 0 : index
    %c0_24 = arith.constant 0 : index
    %66 = vector.load %arg10[%c0_23, %c0_24] : memref<1x8xf32, #tpu.memory_space<vmem>>, vector<1x8xf32>
    tpu.vector_store %arg10[%c0_23, %c0_24], %65 {strides = array<i32>} : memref<1x8xf32, #tpu.memory_space<vmem>>, vector<1x8xf32>,
    return
  }
  func.func @transform_0(%arg0: i32) -> i32 {
    %c0_i32 = arith.constant 0 : i32
    %c0_i32_0 = arith.constant 0 : i32
    return %c0_i32 : i32
  }
  func.func @transform_1(%arg0: i32) -> i32 {
    %c0_i32 = arith.constant 0 : i32
    %c0_i32_0 = arith.constant 0 : i32
    return %c0_i32 : i32
  }
  func.func @transform_2(%arg0: i32) -> i32 {
    %c0_i32 = arith.constant 0 : i32
    %c0_i32_0 = arith.constant 0 : i32
    return %c0_i32 : i32
  }
  func.func @transform_3(%arg0: i32) -> (i32, i32) {
    %c0_i32 = arith.constant 0 : i32
    %c0_i32_0 = arith.constant 0 : i32
    return %arg0, %c0_i32 : i32, i32
  }
  func.func @transform_4(%arg0: i32) -> (i32, i32) {
    %c0_i32 = arith.constant 0 : i32
    %c0_i32_0 = arith.constant 0 : i32
    %c0_i32_1 = arith.constant 0 : i32
    return %c0_i32, %c0_i32_0 : i32, i32
  }
  func.func @transform_5(%arg0: i32) -> (i32, i32) {
    %c0_i32 = arith.constant 0 : i32
    %c0_i32_0 = arith.constant 0 : i32
    %c0_i32_1 = arith.constant 0 : i32
    return %c0_i32, %c0_i32_0 : i32, i32
  }
  func.func @transform_6(%arg0: i32) -> (i32, i32) {
    %c0_i32 = arith.constant 0 : i32
    %c0_i32_0 = arith.constant 0 : i32
    %c0_i32_1 = arith.constant 0 : i32
    return %c0_i32, %c0_i32_0 : i32, i32
  }
  func.func @transform_7(%arg0: i32) -> (i32, i32) {
    %c0_i32 = arith.constant 0 : i32
    %c0_i32_0 = arith.constant 0 : i32
    %c0_i32_1 = arith.constant 0 : i32
    return %c0_i32, %c0_i32_0 : i32, i32
  }
  func.func @transform_8(%arg0: i32) -> (i32, i32) {
    %c0_i32 = arith.constant 0 : i32
    %c0_i32_0 = arith.constant 0 : i32
    %c0_i32_1 = arith.constant 0 : i32
    return %c0_i32, %c0_i32_0 : i32, i32
  }
  func.func @transform_9(%arg0: i32) -> (i32, i32) {
    %c0_i32 = arith.constant 0 : i32
    %c0_i32_0 = arith.constant 0 : i32
    return %c0_i32, %arg0 : i32, i32
  }
}

</mosaic_0001>

<bundles_post_ra>
// kernel: tpu_custom_call.1
= control target key start
LH: loop header
LB: loop body
LE: loop exit
PB: predicated region body
PF: predicated region fallthrough
CT: control target
= control target key end

     0   :  { %16 = vsyncpa [#allocation7], 0  ;;  %s508_s0 = inlined_call_operand.<no memory space> [shape: s32[1], index: 0, kind: input, shape index: {}]   ;;  %s509_s1 = inlined_call_operand.vmem [shape: f32[2], index: 1, kind: input, shape index: {}]   ;;  %s510_s2 = inlined_call_operand.<no memory space> [shape: f32[1], index: 2, kind: input, shape index: {}]   ;;  %s511_s3 = inlined_call_operand.hbm [shape: f32[8,156], index: 3, kind: input, shape index: {}]   ;;  %s512_s4 = inlined_call_operand.hbm [shape: f32[156,128], index: 4, kind: input, shape index: {}]   ;;  %s513_s5 = inlined_call_operand.vmem [shape: f32[1,128], index: 5, kind: input, shape index: {}]   ;;  %s514_s6 = inlined_call_operand.hbm [shape: f32[128,128], index: 6, kind: input, shape index: {}]   ;;  %s515_s7 = inlined_call_operand.vmem [shape: f32[1,128], index: 7, kind: input, shape index: {}]   ;;  %s516_s8 = inlined_call_operand.vmem [shape: f32[1,128], index: 8, kind: input, shape index: {}]   ;;  %s517_s9 = inlined_call_operand.hbm [shape: f32[1,8], index: 9, kind: output, shape index: {}]  }
   0x1   :  { %17 = vsyncpa [#allocation5], 0 }
   0x2   :  { %18 = vsyncpa [#allocation10], 0  ;;  %s48_s11 = sshll.u32 %s512_s4, 4  ;;  %s49_s11 = int_to_ptr.hbm [resolvable:$true] %s48_s11 }
   0x3   :  { %19 = vsyncpa [#allocation6], 0  ;;  %s418_s12 = smov [#allocation9]   ;;  %s27_s16 = sshll.u32 %s509_s1, 4  ;;  %s28_s16 = int_to_ptr.vmem [resolvable:$true] %s27_s16 }
   0x4   :  { %s50_s13 = sshll.u32 %s418_s12, 4  ;;  %s419_s17 = smov 128   ;;  %s51_s13 = int_to_ptr.vmem [resolvable:$true] %s50_s13 }
   0x5   :  { %s420_s18 = smov 8   ;;  %s421_s19 = smov [#allocation4]  }
   0x6   :  { %56 = dma.hbm_to_vmem [thread:$0]  %s49_s11, 2560, %s51_s13, [#allocation10], %s419_s17, %s419_s17, %s420_s18  }
   0x7   :  { %30 = dma.vmem_to_smem %s28_s16, 16, %s421_s19, [#allocation7]  }
   0x8   :  { %s38_s22 = sshll.u32 %s511_s3, 4  ;;  %s422_s4 = smov [#allocation8]   ;;  %s39_s22 = int_to_ptr.hbm [resolvable:$true] %s38_s22 }
   0x9   :  { %s40_s23 = sshll.u32 %s422_s4, 4  ;;  %s63_s26 = sshll.u32 %s514_s6, 4  ;;  %s41_s23 = int_to_ptr.vmem [resolvable:$true] %s40_s23  ;;  %s64_s26 = int_to_ptr.hbm [resolvable:$true] %s63_s26 }
   0xa   :  { %43 = dma.hbm_to_vmem [thread:$0]  %s39_s22, 256, %s41_s23, [#allocation5]  }
   0xb   :  { %s423_s1 = smov [#allocation11]  }
   0xc   :  { %s65_s27 = sshll.u32 %s423_s1, 4  ;;  %s66_s27 = int_to_ptr.vmem [resolvable:$true] %s65_s27 }
   0xd   :  { %71 = dma.hbm_to_vmem [thread:$0]  %s64_s26, 2048, %s66_s27, [#allocation10], %s419_s17, %s419_s17, %s420_s18  }
   0xe   :  { %410 = dma.done.wait [#allocation7], 16  }
   0xf   :  { %411 = vsyncadd [#allocation7], 4294967280 }
  0x10   :  { %412 = dma.done.wait [#allocation5], 256  }
  0x11   :  { %413 = vsyncadd [#allocation5], 4294967040 }
  0x12   :  { %414 = dma.done.wait [#allocation10], 4608  }
  0x13   :  { %415 = vsyncadd [#allocation10], 4294962688 }
  0x14   :  { %92 = sfence }
  0x15   :  { %v112_v0 = vld [vmem:[#allocation9 + $0x78] sm:$0xff]  ;;  %v111_v1 = vld [vmem:[#allocation9 + $0x70] sm:$0xff]  ;;  %v110_v2 = vld [vmem:[#allocation9 + $0x68] sm:$0xff]  ;;  %vm125_vm0 = vcmask 1043456   ;;  %vm121_vm1 = vcmask 228352   ;;  %s487_s3 = sld [smem:[#allocation4]]  ;;  %v218_v46 = vlaneseq }
  0x16   :  { %129 = vmatpush.msra.mxu0 %v112_v0  ;;  %v109_v3 = vld [vmem:[#allocation9 + $0x60] sm:$0xff]  ;;  %v116_v4 = vld [vmem:[#allocation9 + $0x98] sm:$0xf]  ;;  %v115_v5 = vld [vmem:[#allocation9 + $0x90] sm:$0xff]  ;;  %s226_s10 = smul.u32 2654435769, %s508_s0 }
  0x17   :  { %290 = vmatpush.msk.msra.mxu1 %vm125_vm0, %v116_v4  ;;  %v108_v6 = vld [vmem:[#allocation9 + $0x58] sm:$0xff]  ;;  %v114_v7 = vld [vmem:[#allocation9 + $0x88] sm:$0xff]  ;;  %v187_v9 = vld [vmem:[#allocation11 + $0x70] sm:$0xff]  ;;  %v219_v47 = vshrl.u32 %v218_v46, 7  ;;  %v223_v48 = vand.u32 127, %v218_v46  ;;  %s289_s13 = sld [smem:[#allocation4 + $0x1]] }
  0x18   :  { %130 = vmatpush.msra.mxu0 %v111_v1  ;;  %v188_v8 = vld [vmem:[#allocation11 + $0x78] sm:$0xff]  ;;  %v107_v10 = vld [vmem:[#allocation9 + $0x50] sm:$0xff]  ;;  %v113_v11 = vld [vmem:[#allocation9 + $0x80] sm:$0xff]  ;;  %v227_v51 = vstv %s226_s10  ;;  %s277_s19 = sshll.u32 %s517_s9, 4  ;;  %vm268_vm6 = vcmask 57344   ;;  %s278_s19 = int_to_ptr.hbm [resolvable:$true] %s277_s19 }
  0x19   :  { %162 = vmatpush.msra.mxu1 %v115_v5  ;;  %193 = vmatpush.msra.mxu2 %v188_v8  ;;  %v96_v12 = vld [vmem:[#allocation8 + $0x8] sm:$0xff]  ;;  %v186_v13 = vld [vmem:[#allocation11 + $0x68] sm:$0xff]  ;;  %v185_v15 = vld [vmem:[#allocation11 + $0x60] sm:$0xff]  ;;  %v224_v49 = vmul.u32 128, %v219_v47  ;;  %v243_v5 = vstv %s510_s2 }
  0x1a   :  { %131 = vmatpush.msra.mxu0 %v110_v2  ;;  %v106_v14 = vld [vmem:[#allocation9 + $0x48] sm:$0xff]  ;;  %v105_v16 = vld [vmem:[#allocation9 + $0x40] sm:$0xff]  ;;  %v184_v17 = vld [vmem:[#allocation11 + $0x58] sm:$0xff] }
  0x1b   :  { %163 = vmatpush.msra.mxu1 %v114_v7  ;;  %194 = vmatpush.msra.mxu2 %v187_v9  ;;  %v104_v18 = vld [vmem:[#allocation9 + $0x38] sm:$0xff]  ;;  %v183_v19 = vld [vmem:[#allocation11 + $0x50] sm:$0xff]  ;;  %v182_v21 = vld [vmem:[#allocation11 + $0x48] sm:$0xff]  ;;  %v170_v42 = vstv %s487_s3  ;;  %v225_v50 = vadd.s32 %v224_v49, %v223_v48 }
  0x1c   :  { %132 = vmatpush.msra.mxu0 %v109_v3  ;;  %v103_v20 = vld [vmem:[#allocation9 + $0x30] sm:$0xff]  ;;  %v102_v22 = vld [vmem:[#allocation9 + $0x28] sm:$0xff]  ;;  %v181_v23 = vld [vmem:[#allocation11 + $0x40] sm:$0xff] }
  0x1d   :  { %164 = vmatpush.msra.mxu1 %v113_v11  ;;  %195 = vmatpush.msra.mxu2 %v186_v13  ;;  %v101_v24 = vld [vmem:[#allocation9 + $0x20] sm:$0xff]  ;;  %v180_v25 = vld [vmem:[#allocation11 + $0x38] sm:$0xff]  ;;  %v179_v27 = vld [vmem:[#allocation11 + $0x30] sm:$0xff]  ;;  %v228_v52 = vadd.s32 %v227_v51, %v225_v50  ;;  %v265_v7 = vstv %s289_s13 }
  0x1e   :  { %133 = vmatpush.msra.mxu0 %v108_v6  ;;  %291 = vmatmul.msk.f32.vlgmr.msra.gmra.mxu1 %vm121_vm1, %v96_v12  ;;  %v100_v26 = vld [vmem:[#allocation9 + $0x18] sm:$0xff]  ;;  %v99_v28 = vld [vmem:[#allocation9 + $0x10] sm:$0xff]  ;;  %v178_v29 = vld [vmem:[#allocation11 + $0x28] sm:$0xff] }
  0x1f   :  { %196 = vmatpush.msra.mxu2 %v185_v15  ;;  %v98_v30 = vld [vmem:[#allocation9 + $0x8] sm:$0xff]  ;;  %v177_v31 = vld [vmem:[#allocation11 + $0x20] sm:$0xff]  ;;  %v95_v33 = vld [vmem:[#allocation8] sm:$0xff]  ;;  %v229_v53 = vshrl.u32 %v228_v52, 16 }
  0x20   :  { %134 = vmatpush.msra.mxu0 %v107_v10  ;;  %v97_v32 = vld [vmem:[#allocation9] sm:$0xff]  ;;  %v176_v34 = vld [vmem:[#allocation11 + $0x18] sm:$0xff]  ;;  %v175_v35 = vld [vmem:[#allocation11 + $0x10] sm:$0xff] }
  0x21   :  { %197 = vmatpush.msra.mxu2 %v184_v17  ;;  %v174_v36 = vld [vmem:[#allocation11 + $0x8] sm:$0xff]  ;;  %v173_v37 = vld [vmem:[#allocation11] sm:$0xff]  ;;  %v300_v38 = vld [vmem:[%s513_s5] ss:$0 sm:$0xff]  ;;  %v230_v54 = vxor.u32 %v229_v53, %v228_v52 }
  0x22   :  { %135 = vmatpush.msra.mxu0 %v106_v14  ;;  %v301_v60 = vld [vmem:[%s515_s7] ss:$0 sm:$0xff]  ;;  %s424_s7 = smov [#allocation12]  }
  0x23   :  { %198 = vmatpush.msra.mxu2 %v183_v19  ;;  %v231_v55 = vmul.u32 2246822507, %v230_v54  ;;  %v241_v4 = vld [vmem:[%s516_s8] sm:$0x1]  ;;  %s275_s16 = sshll.u32 %s424_s7, 4  ;;  %s276_s16 = int_to_ptr.vmem [resolvable:$true] %s275_s16 }
  0x24   :  { %136 = vmatpush.msra.mxu0 %v105_v16 }
  0x25   :  { %199 = vmatpush.msra.mxu2 %v182_v21  ;;  %v232_v56 = vshrl.u32 %v231_v55, 13 }
  0x26   :  { %137 = vmatpush.msra.mxu0 %v104_v18 }
  0x27   :  { %200 = vmatpush.msra.mxu2 %v181_v23  ;;  %v233_v57 = vxor.u32 %v232_v56, %v231_v55 }
  0x28   :  { %138 = vmatpush.msra.mxu0 %v103_v20 }
  0x29   :  { %201 = vmatpush.msra.mxu2 %v180_v25  ;;  %v234_v58 = vmul.u32 3266489909, %v233_v57 }
  0x2a   :  { %139 = vmatpush.msra.mxu0 %v102_v22 }
  0x2b   :  { %202 = vmatpush.msra.mxu2 %v179_v27  ;;  %v235_v59 = vshrl.u32 %v234_v58, 16 }
  0x2c   :  { %140 = vmatpush.msra.mxu0 %v101_v24 }
  0x2d   :  { %203 = vmatpush.msra.mxu2 %v178_v29  ;;  %v236_v61 = vxor.u32 %v235_v59, %v234_v58 }
  0x2e   :  { %141 = vmatpush.msra.mxu0 %v100_v26 }
  0x2f   :  { %204 = vmatpush.msra.mxu2 %v177_v31  ;;  %v237_v0 = vshrl.u32 %v236_v61, 8 }
  0x30   :  { %142 = vmatpush.msra.mxu0 %v99_v28 }
  0x31   :  { %205 = vmatpush.msra.mxu2 %v176_v34  ;;  %vm238_vm4 = vcmp.ge.s32.totalorder %v237_v0, 1677721 }
  0x32   :  { %143 = vmatpush.msra.mxu0 %v98_v30 }
  0x33   :  { %206 = vmatpush.msra.mxu2 %v175_v35 }
  0x34   :  { %144 = vmatpush.msra.mxu0 %v97_v32 }
  0x35   :  { %145 = vmatmul.f32.vlgmr.msra.gmra.mxu0 %v95_v33  ;;  %207 = vmatpush.msra.mxu2 %v174_v36 }
  0x37   :  { %208 = vmatpush.msra.mxu2 %v173_v37 }
  0x9b   :  { %v166_v40 = vpop.f32.mrf.mxu1 }
  0xb2   :  { %v146_v39 = vpop.f32.mrf.mxu0 }
  0xb3   :  { %v147_v41 = vadd.f32 %v300_v38, %v146_v39 }
  0xb5   :  { %v167_v43 = vadd.f32 %v166_v40, %v147_v41 }
  0xb7   :  { %vm169_vm2 = vcmp.gt.f32.partialorder %v167_v43, 0.0  ;;  %v171_v44 = vmul.f32 %v170_v42, %v167_v43 }
  0xb9   :  { %v172_v45 = vsel %vm169_vm2, %v167_v43, %v171_v44 }
  0xba   :  { %209 = vmatmul.f32.vlgmr.msra.gmra.mxu2 %v172_v45 }
 0x13d   :  { %v210_v62 = vpop.f32.mrf.mxu2 }
 0x13e   :  { %v211_v63 = vadd.f32 %v301_v60, %v210_v62 }
 0x140   :  { %v214_v1 = vmul.f32 %v211_v63, %v170_v42  ;;  %vm213_vm3 = vcmp.gt.f32.partialorder %v211_v63, 0.0 }
 0x142   :  { %v215_v2 = vsel %vm213_vm3, %v211_v63, %v214_v1 }
 0x143   :  { %v239_v3 = vmul.f32 1.1111112, %v215_v2 }
 0x145   :  { %292 = vmatpush.xpose.msk.msra.mxu3 %vm238_vm4, %v239_v3 }
 0x148   :  { %260 = vmatmul.f32.vlgmr.msra.gmra.mxu3 %v241_v4 }
 0x1cb   :  { %v261_v6 = vpop.f32.mrf.mxu3 }
 0x1cc   :  { %v262_v8 = vadd.f32 %v261_v6, %v243_v5 }
 0x1ce   :  { %v266_v9 = vmul.f32 %v265_v7, %v262_v8  ;;  %vm264_vm5 = vcmp.gt.f32.partialorder %v262_v8, 0.0 }
 0x1d0   :  { %v267_v10 = vsel %vm264_vm5, %v262_v8, %v266_v9 }
 0x1d1   :  { %269 = vst.msk [vmem:[#allocation12] sm:$0x1] %vm268_vm6, %v267_v10 }
 0x1d2   :  { %280 = dma.vmem_to_hbm [thread:$0]  %s276_s16, 16, %s278_s19, [#allocation6]  }
 0x1d3   :  { %416 = dma.done.wait [#allocation6], 16  }
 0x1d4   :  { %417 = vsyncadd [#allocation6], 4294967280 }
 0x1d5   :  { %285 = vsyncpa [#allocation5], 1 }
 0x1d6   :  { %286 = vsyncpa [#allocation10], 1 }
 0x1d7   :  { %287 = vsyncpa [#allocation6], 1 }
 0x1d8   :  { %288 = vsyncpa [#allocation7], 1 }

</bundles_post_ra>
